<compile_context>
chip_gen: v7x
topology: tpu7x:2x2x1
jax: 0.10.0
libtpu: 0.0.40
codegen_flags: <defaults>
</compile_context>

<pallas_src>
import jax
import jax.numpy as jnp
from jax import lax
from jax.experimental import pallas as pl
from jax.experimental.pallas import tpu as pltpu

# ----------------------------- model dims (small, arg-driven) ---------------
T = 8        # max sequence length
B = 8        # batch size
D = 128      # args.word_embed_dim  (GLOVE_DIM stand-in, kept lane-aligned)
H = 128      # args.encoder_dim
C = 4        # args.n_classes
C_PAD = 128  # lane-dense padded class dimension


# ----------------------------- fused forward kernel -------------------------
def fused_forward_kernel(meta_ref, x_ref, wih_ref, whh_ref, wfc_ref, bias_ref,
                         hyper_ref, out_ref):
    """Single invocation: RNN encode + masked max-pool + classifier + CE + reg.

    Output slab (B, C_PAD): logits in [:, :C] (padded lanes = -1e30),
    scalar loss parked at [0, C].
    """
    # ---- weights resident in VMEM (f32 master copies) -----------------------
    wih = wih_ref[...]            # (D, H)
    whh = whh_ref[...]            # (H, H)
    wfc = wfc_ref[...]            # (H, C_PAD)  zero-padded beyond C -> inert
    bias = bias_ref[...]          # (2, H): row 0 = b_h, row 1 = b_fc (padded)
    b_h = bias[0:1, :]            # (1, H)
    b_fc = bias[1:2, :]           # (1, C_PAD)

    # ---- regularizer: exact f32 sum ||p||^2 on resident tiles ---------------
    sumsq = (jnp.sum(wih * wih) + jnp.sum(whh * whh)
             + jnp.sum(wfc * wfc) + jnp.sum(bias * bias))
    reg = hyper_ref[0, 0] * 0.5 * jnp.sqrt(sumsq)

    # ---- bf16 operands for single-pass MXU matmuls (f32 accumulation) -------
    x_bf = x_ref[...].astype(jnp.bfloat16)        # (T*B, D)
    wih_bf = wih.astype(jnp.bfloat16)
    whh_bf = whh.astype(jnp.bfloat16)
    wfc_bf = wfc.astype(jnp.bfloat16)

    # ---- hoisted input projection: one (T*B, D) @ (D, H) MXU call -----------
    xw = jnp.dot(x_bf, wih_bf, preferred_element_type=jnp.float32) + b_h

    # ---- per-row metadata: lane 0 = seq length, lane 1 = label --------------
    meta = meta_ref[...]                           # (B, 2) f32
    lens_col = meta[:, 0:1]                        # (B, 1)
    label_col = meta[:, 1:2]                       # (B, 1)

    # ---- Elman recurrence + length-masked max-pool (fully unrolled) ---------
    # t = 0: h_prev == 0, so skip the recurrent matmul; lens >= 1 always
    # (collate_pad_ clamps), so the max-pool is seeded with h_0 unmasked.
    h = jnp.tanh(xw[0:B, :])                       # (B, H) f32
    mx = h
    for t in range(1, T):                          # static, straight-line
        h = jnp.tanh(xw[t * B:(t + 1) * B, :]
                     + jnp.dot(h.astype(jnp.bfloat16), whh_bf,
                               preferred_element_type=jnp.float32))
        valid = jnp.float32(t) < lens_col          # (B, 1) time mask
        mx = jnp.where(valid, jnp.maximum(mx, h), mx)
    feats = mx                                     # (B, H)

    # ---- classifier + cross-entropy (+ reg), lane-dense C_PAD ---------------
    logits = jnp.dot(feats.astype(jnp.bfloat16), wfc_bf,
                     preferred_element_type=jnp.float32) + b_fc
    lane = lax.broadcasted_iota(jnp.int32, (B, C_PAD), 1)
    masked = jnp.where(lane < C, logits, -1e30)    # kill padded classes

    m = jnp.max(masked, axis=-1, keepdims=True)
    lse = m + jnp.log(jnp.sum(jnp.exp(masked - m), axis=-1, keepdims=True))
    logp = masked - lse
    onehot = (lane.astype(jnp.float32) == label_col).astype(jnp.float32)
    nll = -jnp.sum(onehot * logp, axis=-1, keepdims=True)    # (B, 1)
    ce = jnp.sum(nll) * (1.0 / B)
    loss_val = ce + reg

    # ---- single full-lane store: logits slab with loss folded into [0, C] ---
    row = lax.broadcasted_iota(jnp.int32, (B, C_PAD), 0)
    slab = jnp.where(jnp.logical_and(row == 0, lane == C), loss_val, masked)
    out_ref[...] = slab


def fused_forward(meta, x2d, w_ih, w_hh, w_fc_pad, bias_slab, hyper2d):
    vmem = pl.BlockSpec(memory_space=pltpu.MemorySpace.VMEM)
    smem = pl.BlockSpec(memory_space=pltpu.MemorySpace.SMEM)
    return pl.pallas_call(
        fused_forward_kernel,
        out_shape=jax.ShapeDtypeStruct((B, C_PAD), jnp.float32),
        in_specs=[
            vmem,   # meta      (B, 2)     f32 [lens, label]
            vmem,   # x2d       (T*B, D)   f32 (seq-major flatten of (T,B,D))
            vmem,   # W_ih      (D, H)     f32
            vmem,   # W_hh      (H, H)     f32
            vmem,   # W_fc      (H, C_PAD) f32, lane-padded persistent layout
            vmem,   # bias slab (2, H)     f32: [b_h; b_fc_pad]
            smem,   # hyperparameter (1,1) f32 scalar
        ],
        out_specs=vmem,
    )(meta, x2d, w_ih, w_hh, w_fc_pad, bias_slab, hyper2d)


# ----------------------------- Learner forward (query-eval hot path) --------
@jax.jit
def learner_query_step(params, hyperparameter, s_embed, s_lens, labels):
    """Pallas-backed equivalent of:
         q_outputs = predict(rnn_model, q_input)
         q_loss    = CE(q_outputs, q_labels) + hyper/2 * sqrt(sum ||p||^2)
         acc       = accuracy(argmax(softmax(q_outputs)), q_labels)
    """
    w_ih, w_hh, w_fc_pad, bias_slab = params

    # Tiny (B, 2) metadata slab: lane 0 = length, lane 1 = label (as f32).
    meta = jnp.concatenate(
        [s_lens.astype(jnp.float32).reshape(B, 1),
         labels.astype(jnp.float32).reshape(B, 1)], axis=1)
    x2d = s_embed.reshape(T * B, D)      # layout-preserving flatten of (T, B, D)
    hyper2d = jnp.reshape(hyperparameter, (1, 1)).astype(jnp.float32)

    slab = fused_forward(meta, x2d, w_ih, w_hh, w_fc_pad, bias_slab, hyper2d)
    logits = slab[:, :C]
    loss = slab[0, C]

    # softmax / argmax / accuracy: cheap glue (matches F.softmax + argmax).
    probs = jax.nn.softmax(logits, axis=1)
    preds = jnp.argmax(probs, axis=1)
    acc = jnp.mean((preds == labels).astype(jnp.float32))

    # TODO(synk): the inner/outer SGD updates, autograd hypergradient
    # (hypergradient()), LR scheduling and DataLoader collation of
    # Learner.forward are host-side training mechanics with no Pallas kernel
    # equivalent; only the model evaluation / loss hot path is implemented.
    # TODO(synk): biggest remaining lever (per review) is batching K pending
    # task evaluations into one call (leading "parallel" task axis) so the MXU
    # sees >8 rows and launch cost amortizes; requires restructuring the
    # host-side meta loop, so it is not done here.
    return acc, loss


# ----------------------------- deterministic parameter init -----------------
def init_params(key):
    """Parameters stored directly in the kernel's persistent padded layout."""
    k1, k2, k3, _ = jax.random.split(key, 4)
    scale_ih = 1.0 / jnp.sqrt(D)
    scale_hh = 1.0 / jnp.sqrt(H)
    w_ih = jax.random.uniform(k1, (D, H), jnp.float32, -scale_ih, scale_ih)
    w_hh = jax.random.uniform(k2, (H, H), jnp.float32, -scale_hh, scale_hh)
    w_fc = jax.random.uniform(k3, (H, C), jnp.float32, -scale_hh, scale_hh)
    # Lane-dense padded classifier weight (zeros beyond C are inert for both
    # the matmul and the ||p||^2 regularizer).
    w_fc_pad = jnp.zeros((H, C_PAD), jnp.float32).at[:, :C].set(w_fc)
    # Bias slab: row 0 = b_h (H lanes), row 1 = b_fc (C_PAD lanes, zero-padded).
    bias_slab = jnp.zeros((2, H), jnp.float32)
    return (w_ih, w_hh, w_fc_pad, bias_slab)


if __name__ == "__main__":
    key = jax.random.PRNGKey(0)
    kp, kx, kl, ky = jax.random.split(key, 4)

    params = init_params(kp)
    hyperparameter = jnp.zeros((), jnp.float32)   # torch.zeros(1) hyperparamter

    # Query batch, layout (T, B, D) seq-first as produced by collate_pad_.
    s_lens = jax.random.randint(kl, (B,), 1, T + 1).astype(jnp.int32)
    s_embed = jax.random.normal(kx, (T, B, D), jnp.float32)
    time_idx = jnp.arange(T)[:, None]                            # (T, 1)
    pad_mask = (time_idx < s_lens[None, :]).astype(jnp.float32)  # (T, B)
    s_embed = s_embed * pad_mask[:, :, None]                     # zero-pad like collate
    labels = jax.random.randint(ky, (B,), 0, C).astype(jnp.int32)

    acc, loss = learner_query_step(params, hyperparameter, s_embed, s_lens,
                                   labels)
    jax.block_until_ready((acc, loss))
    print("KERNEL_OK")
</pallas_src>

<mosaic_0001>
module attributes {stable_mosaic.version = 11 : i64} {
  func.func @fused_forward_kernel(%arg0: memref<8x2xf32, #tpu.memory_space<vmem>>, %arg1: memref<64x128xf32, #tpu.memory_space<vmem>>, %arg2: memref<128x128xf32, #tpu.memory_space<vmem>>, %arg3: memref<128x128xf32, #tpu.memory_space<vmem>>, %arg4: memref<128x128xf32, #tpu.memory_space<vmem>>, %arg5: memref<2x128xf32, #tpu.memory_space<vmem>>, %arg6: memref<1x1xf32, #tpu.memory_space<smem>>, %arg7: memref<8x128xf32, #tpu.memory_space<vmem>>) attributes {dimension_semantics = [], scalar_prefetch = 0 : i64, scratch_operands = 0 : i64, tpu.core_type = #tpu.core_type<tc>} {
    %c0 = arith.constant 0 : index
    %c0_0 = arith.constant 0 : index
    %0 = vector.load %arg2[%c0, %c0_0] : memref<128x128xf32, #tpu.memory_space<vmem>>, vector<128x128xf32>
    %c0_1 = arith.constant 0 : index
    %c0_2 = arith.constant 0 : index
    %1 = vector.load %arg3[%c0_1, %c0_2] : memref<128x128xf32, #tpu.memory_space<vmem>>, vector<128x128xf32>
    %c0_3 = arith.constant 0 : index
    %c0_4 = arith.constant 0 : index
    %2 = vector.load %arg4[%c0_3, %c0_4] : memref<128x128xf32, #tpu.memory_space<vmem>>, vector<128x128xf32>
    %c0_5 = arith.constant 0 : index
    %c0_6 = arith.constant 0 : index
    %3 = vector.load %arg5[%c0_5, %c0_6] : memref<2x128xf32, #tpu.memory_space<vmem>>, vector<2x128xf32>
    %4 = vector.extract_strided_slice %3 {offsets = [0, 0], sizes = [1, 128], strides = [1, 1]} : vector<2x128xf32> to vector<1x128xf32>
    %5 = vector.extract_strided_slice %3 {offsets = [1, 0], sizes = [1, 128], strides = [1, 1]} : vector<2x128xf32> to vector<1x128xf32>
    %6 = arith.mulf %0, %0 : vector<128x128xf32>
    %7 = vector.shape_cast %6 : vector<128x128xf32> to vector<1x128x128xf32>
    %cst = arith.constant dense<0.000000e+00> : vector<1xf32>
    %8 = vector.multi_reduction <add>, %7, %cst [1, 2] : vector<1x128x128xf32> to vector<1xf32>
    %9 = vector.shape_cast %8 : vector<1xf32> to vector<1x1x1xf32>
    %10 = vector.extract %9[0, 0, 0] : f32 from vector<1x1x1xf32>
    %11 = arith.mulf %1, %1 : vector<128x128xf32>
    %12 = vector.shape_cast %11 : vector<128x128xf32> to vector<1x128x128xf32>
    %cst_7 = arith.constant dense<0.000000e+00> : vector<1xf32>
    %13 = vector.multi_reduction <add>, %12, %cst_7 [1, 2] : vector<1x128x128xf32> to vector<1xf32>
    %14 = vector.shape_cast %13 : vector<1xf32> to vector<1x1x1xf32>
    %15 = vector.extract %14[0, 0, 0] : f32 from vector<1x1x1xf32>
    %16 = arith.addf %10, %15 : f32
    %17 = arith.mulf %2, %2 : vector<128x128xf32>
    %18 = vector.shape_cast %17 : vector<128x128xf32> to vector<1x128x128xf32>
    %cst_8 = arith.constant dense<0.000000e+00> : vector<1xf32>
    %19 = vector.multi_reduction <add>, %18, %cst_8 [1, 2] : vector<1x128x128xf32> to vector<1xf32>
    %20 = vector.shape_cast %19 : vector<1xf32> to vector<1x1x1xf32>
    %21 = vector.extract %20[0, 0, 0] : f32 from vector<1x1x1xf32>
    %22 = arith.addf %16, %21 : f32
    %23 = arith.mulf %3, %3 : vector<2x128xf32>
    %24 = vector.shape_cast %23 : vector<2x128xf32> to vector<1x2x128xf32>
    %cst_9 = arith.constant dense<0.000000e+00> : vector<1xf32>
    %25 = vector.multi_reduction <add>, %24, %cst_9 [1, 2] : vector<1x2x128xf32> to vector<1xf32>
    %26 = vector.shape_cast %25 : vector<1xf32> to vector<1x1x1xf32>
    %27 = vector.extract %26[0, 0, 0] : f32 from vector<1x1x1xf32>
    %28 = arith.addf %22, %27 : f32
    %c0_10 = arith.constant 0 : index
    %c0_11 = arith.constant 0 : index
    %29 = memref.load %arg6[%c0_10, %c0_11] : memref<1x1xf32, #tpu.memory_space<smem>>
    %cst_12 = arith.constant 5.000000e-01 : f32
    %30 = arith.mulf %29, %cst_12 : f32
    %31 = math.sqrt %28 : f32
    %32 = arith.mulf %30, %31 : f32
    %c0_13 = arith.constant 0 : index
    %c0_14 = arith.constant 0 : index
    %33 = vector.load %arg1[%c0_13, %c0_14] : memref<64x128xf32, #tpu.memory_space<vmem>>, vector<64x128xf32>
    %34 = arith.truncf %33 : vector<64x128xf32> to vector<64x128xbf16>
    %35 = arith.truncf %0 : vector<128x128xf32> to vector<128x128xbf16>
    %36 = arith.truncf %1 : vector<128x128xf32> to vector<128x128xbf16>
    %37 = arith.truncf %2 : vector<128x128xf32> to vector<128x128xbf16>
    %cst_15 = arith.constant dense<0.000000e+00> : vector<64x128xf32>
    %38 = tpu.matmul %34, %35, %cst_15 {dimension_numbers = #tpu.dot_dimension_numbers<[1], [0], [0], [1], [0, 0, 1, 1], [], []>} : vector<64x128xbf16>, vector<128x128xbf16>, vector<64x128xf32> -> vector<64x128xf32>
    %39 = vector.broadcast %4 : vector<1x128xf32> to vector<64x128xf32>
    %40 = arith.addf %38, %39 : vector<64x128xf32>
    %c0_16 = arith.constant 0 : index
    %c0_17 = arith.constant 0 : index
    %41 = vector.load %arg0[%c0_16, %c0_17] : memref<8x2xf32, #tpu.memory_space<vmem>>, vector<8x2xf32>
    %42 = vector.extract_strided_slice %41 {offsets = [0, 0], sizes = [8, 1], strides = [1, 1]} : vector<8x2xf32> to vector<8x1xf32>
    %43 = vector.extract_strided_slice %41 {offsets = [0, 1], sizes = [8, 1], strides = [1, 1]} : vector<8x2xf32> to vector<8x1xf32>
    %44 = vector.extract_strided_slice %40 {offsets = [0, 0], sizes = [8, 128], strides = [1, 1]} : vector<64x128xf32> to vector<8x128xf32>
    %45 = math.tanh %44 : vector<8x128xf32>
    %46 = vector.extract_strided_slice %40 {offsets = [8, 0], sizes = [8, 128], strides = [1, 1]} : vector<64x128xf32> to vector<8x128xf32>
    %47 = arith.truncf %45 : vector<8x128xf32> to vector<8x128xbf16>
    %cst_18 = arith.constant dense<0.000000e+00> : vector<8x128xf32>
    %48 = tpu.matmul %47, %36, %cst_18 {dimension_numbers = #tpu.dot_dimension_numbers<[1], [0], [0], [1], [0, 0, 1, 1], [], []>} : vector<8x128xbf16>, vector<128x128xbf16>, vector<8x128xf32> -> vector<8x128xf32>
    %49 = arith.addf %46, %48 : vector<8x128xf32>
    %50 = math.tanh %49 : vector<8x128xf32>
    %cst_19 = arith.constant 1.000000e+00 : f32
    %51 = vector.broadcast %cst_19 : f32 to vector<8x1xf32>
    %52 = arith.cmpf olt, %51, %42 : vector<8x1xf32>
    %53 = arith.maximumf %45, %50 : vector<8x128xf32>
    %54 = vector.shape_cast %52 : vector<8x1xi1> to vector<8x1xi1>
    %55 = vector.broadcast %54 : vector<8x1xi1> to vector<8x128xi1>
    %56 = arith.select %55, %53, %45 : vector<8x128xi1>, vector<8x128xf32>
    %57 = vector.extract_strided_slice %40 {offsets = [16, 0], sizes = [8, 128], strides = [1, 1]} : vector<64x128xf32> to vector<8x128xf32>
    %58 = arith.truncf %50 : vector<8x128xf32> to vector<8x128xbf16>
    %cst_20 = arith.constant dense<0.000000e+00> : vector<8x128xf32>
    %59 = tpu.matmul %58, %36, %cst_20 {dimension_numbers = #tpu.dot_dimension_numbers<[1], [0], [0], [1], [0, 0, 1, 1], [], []>} : vector<8x128xbf16>, vector<128x128xbf16>, vector<8x128xf32> -> vector<8x128xf32>
    %60 = arith.addf %57, %59 : vector<8x128xf32>
    %61 = math.tanh %60 : vector<8x128xf32>
    %cst_21 = arith.constant 2.000000e+00 : f32
    %62 = vector.broadcast %cst_21 : f32 to vector<8x1xf32>
    %63 = arith.cmpf olt, %62, %42 : vector<8x1xf32>
    %64 = arith.maximumf %56, %61 : vector<8x128xf32>
    %65 = vector.shape_cast %63 : vector<8x1xi1> to vector<8x1xi1>
    %66 = vector.broadcast %65 : vector<8x1xi1> to vector<8x128xi1>
    %67 = arith.select %66, %64, %56 : vector<8x128xi1>, vector<8x128xf32>
    %68 = vector.extract_strided_slice %40 {offsets = [24, 0], sizes = [8, 128], strides = [1, 1]} : vector<64x128xf32> to vector<8x128xf32>
    %69 = arith.truncf %61 : vector<8x128xf32> to vector<8x128xbf16>
    %cst_22 = arith.constant dense<0.000000e+00> : vector<8x128xf32>
    %70 = tpu.matmul %69, %36, %cst_22 {dimension_numbers = #tpu.dot_dimension_numbers<[1], [0], [0], [1], [0, 0, 1, 1], [], []>} : vector<8x128xbf16>, vector<128x128xbf16>, vector<8x128xf32> -> vector<8x128xf32>
    %71 = arith.addf %68, %70 : vector<8x128xf32>
    %72 = math.tanh %71 : vector<8x128xf32>
    %cst_23 = arith.constant 3.000000e+00 : f32
    %73 = vector.broadcast %cst_23 : f32 to vector<8x1xf32>
    %74 = arith.cmpf olt, %73, %42 : vector<8x1xf32>
    %75 = arith.maximumf %67, %72 : vector<8x128xf32>
    %76 = vector.shape_cast %74 : vector<8x1xi1> to vector<8x1xi1>
    %77 = vector.broadcast %76 : vector<8x1xi1> to vector<8x128xi1>
    %78 = arith.select %77, %75, %67 : vector<8x128xi1>, vector<8x128xf32>
    %79 = vector.extract_strided_slice %40 {offsets = [32, 0], sizes = [8, 128], strides = [1, 1]} : vector<64x128xf32> to vector<8x128xf32>
    %80 = arith.truncf %72 : vector<8x128xf32> to vector<8x128xbf16>
    %cst_24 = arith.constant dense<0.000000e+00> : vector<8x128xf32>
    %81 = tpu.matmul %80, %36, %cst_24 {dimension_numbers = #tpu.dot_dimension_numbers<[1], [0], [0], [1], [0, 0, 1, 1], [], []>} : vector<8x128xbf16>, vector<128x128xbf16>, vector<8x128xf32> -> vector<8x128xf32>
    %82 = arith.addf %79, %81 : vector<8x128xf32>
    %83 = math.tanh %82 : vector<8x128xf32>
    %cst_25 = arith.constant 4.000000e+00 : f32
    %84 = vector.broadcast %cst_25 : f32 to vector<8x1xf32>
    %85 = arith.cmpf olt, %84, %42 : vector<8x1xf32>
    %86 = arith.maximumf %78, %83 : vector<8x128xf32>
    %87 = vector.shape_cast %85 : vector<8x1xi1> to vector<8x1xi1>
    %88 = vector.broadcast %87 : vector<8x1xi1> to vector<8x128xi1>
    %89 = arith.select %88, %86, %78 : vector<8x128xi1>, vector<8x128xf32>
    %90 = vector.extract_strided_slice %40 {offsets = [40, 0], sizes = [8, 128], strides = [1, 1]} : vector<64x128xf32> to vector<8x128xf32>
    %91 = arith.truncf %83 : vector<8x128xf32> to vector<8x128xbf16>
    %cst_26 = arith.constant dense<0.000000e+00> : vector<8x128xf32>
    %92 = tpu.matmul %91, %36, %cst_26 {dimension_numbers = #tpu.dot_dimension_numbers<[1], [0], [0], [1], [0, 0, 1, 1], [], []>} : vector<8x128xbf16>, vector<128x128xbf16>, vector<8x128xf32> -> vector<8x128xf32>
    %93 = arith.addf %90, %92 : vector<8x128xf32>
    %94 = math.tanh %93 : vector<8x128xf32>
    %cst_27 = arith.constant 5.000000e+00 : f32
    %95 = vector.broadcast %cst_27 : f32 to vector<8x1xf32>
    %96 = arith.cmpf olt, %95, %42 : vector<8x1xf32>
    %97 = arith.maximumf %89, %94 : vector<8x128xf32>
    %98 = vector.shape_cast %96 : vector<8x1xi1> to vector<8x1xi1>
    %99 = vector.broadcast %98 : vector<8x1xi1> to vector<8x128xi1>
    %100 = arith.select %99, %97, %89 : vector<8x128xi1>, vector<8x128xf32>
    %101 = vector.extract_strided_slice %40 {offsets = [48, 0], sizes = [8, 128], strides = [1, 1]} : vector<64x128xf32> to vector<8x128xf32>
    %102 = arith.truncf %94 : vector<8x128xf32> to vector<8x128xbf16>
    %cst_28 = arith.constant dense<0.000000e+00> : vector<8x128xf32>
    %103 = tpu.matmul %102, %36, %cst_28 {dimension_numbers = #tpu.dot_dimension_numbers<[1], [0], [0], [1], [0, 0, 1, 1], [], []>} : vector<8x128xbf16>, vector<128x128xbf16>, vector<8x128xf32> -> vector<8x128xf32>
    %104 = arith.addf %101, %103 : vector<8x128xf32>
    %105 = math.tanh %104 : vector<8x128xf32>
    %cst_29 = arith.constant 6.000000e+00 : f32
    %106 = vector.broadcast %cst_29 : f32 to vector<8x1xf32>
    %107 = arith.cmpf olt, %106, %42 : vector<8x1xf32>
    %108 = arith.maximumf %100, %105 : vector<8x128xf32>
    %109 = vector.shape_cast %107 : vector<8x1xi1> to vector<8x1xi1>
    %110 = vector.broadcast %109 : vector<8x1xi1> to vector<8x128xi1>
    %111 = arith.select %110, %108, %100 : vector<8x128xi1>, vector<8x128xf32>
    %112 = vector.extract_strided_slice %40 {offsets = [56, 0], sizes = [8, 128], strides = [1, 1]} : vector<64x128xf32> to vector<8x128xf32>
    %113 = arith.truncf %105 : vector<8x128xf32> to vector<8x128xbf16>
    %cst_30 = arith.constant dense<0.000000e+00> : vector<8x128xf32>
    %114 = tpu.matmul %113, %36, %cst_30 {dimension_numbers = #tpu.dot_dimension_numbers<[1], [0], [0], [1], [0, 0, 1, 1], [], []>} : vector<8x128xbf16>, vector<128x128xbf16>, vector<8x128xf32> -> vector<8x128xf32>
    %115 = arith.addf %112, %114 : vector<8x128xf32>
    %116 = math.tanh %115 : vector<8x128xf32>
    %cst_31 = arith.constant 7.000000e+00 : f32
    %117 = vector.broadcast %cst_31 : f32 to vector<8x1xf32>
    %118 = arith.cmpf olt, %117, %42 : vector<8x1xf32>
    %119 = arith.maximumf %111, %116 : vector<8x128xf32>
    %120 = vector.shape_cast %118 : vector<8x1xi1> to vector<8x1xi1>
    %121 = vector.broadcast %120 : vector<8x1xi1> to vector<8x128xi1>
    %122 = arith.select %121, %119, %111 : vector<8x128xi1>, vector<8x128xf32>
    %123 = arith.truncf %122 : vector<8x128xf32> to vector<8x128xbf16>
    %cst_32 = arith.constant dense<0.000000e+00> : vector<8x128xf32>
    %124 = tpu.matmul %123, %37, %cst_32 {dimension_numbers = #tpu.dot_dimension_numbers<[1], [0], [0], [1], [0, 0, 1, 1], [], []>} : vector<8x128xbf16>, vector<128x128xbf16>, vector<8x128xf32> -> vector<8x128xf32>
    %125 = vector.broadcast %5 : vector<1x128xf32> to vector<8x128xf32>
    %126 = arith.addf %124, %125 : vector<8x128xf32>
    %127 = tpu.iota {dimensions = array<i32: 1>} : vector<8x128xi32>
    %c4_i32 = arith.constant 4 : i32
    %128 = vector.broadcast %c4_i32 : i32 to vector<8x128xi32>
    %129 = arith.cmpi slt, %127, %128 : vector<8x128xi32>
    %cst_33 = arith.constant -1.000000e+30 : f32
    %130 = vector.broadcast %cst_33 : f32 to vector<8x128xf32>
    %131 = arith.select %129, %126, %130 : vector<8x128xi1>, vector<8x128xf32>
    %cst_34 = arith.constant dense<0xFF800000> : vector<8xf32>
    %132 = vector.multi_reduction <maximumf>, %131, %cst_34 [1] : vector<8x128xf32> to vector<8xf32>
    %133 = vector.shape_cast %132 : vector<8xf32> to vector<8x1xf32>
    %134 = vector.broadcast %133 : vector<8x1xf32> to vector<8x128xf32>
    %135 = arith.subf %131, %134 : vector<8x128xf32>
    %136 = math.exp %135 : vector<8x128xf32>
    %cst_35 = arith.constant dense<0.000000e+00> : vector<8xf32>
    %137 = vector.multi_reduction <add>, %136, %cst_35 [1] : vector<8x128xf32> to vector<8xf32>
    %138 = vector.shape_cast %137 : vector<8xf32> to vector<8x1xf32>
    %139 = math.log %138 : vector<8x1xf32>
    %140 = arith.addf %133, %139 : vector<8x1xf32>
    %141 = vector.broadcast %140 : vector<8x1xf32> to vector<8x128xf32>
    %142 = arith.subf %131, %141 : vector<8x128xf32>
    %143 = arith.sitofp %127 : vector<8x128xi32> to vector<8x128xf32>
    %144 = vector.broadcast %43 : vector<8x1xf32> to vector<8x128xf32>
    %145 = arith.cmpf oeq, %143, %144 : vector<8x128xf32>
    %146 = arith.extui %145 : vector<8x128xi1> to vector<8x128xi32>
    %147 = arith.sitofp %146 : vector<8x128xi32> to vector<8x128xf32>
    %148 = arith.mulf %147, %142 : vector<8x128xf32>
    %cst_36 = arith.constant dense<0.000000e+00> : vector<8xf32>
    %149 = vector.multi_reduction <add>, %148, %cst_36 [1] : vector<8x128xf32> to vector<8xf32>
    %150 = vector.shape_cast %149 : vector<8xf32> to vector<8x1xf32>
    %cst_37 = arith.constant 0.000000e+00 : f32
    %151 = vector.broadcast %cst_37 : f32 to vector<8x1xf32>
    %152 = arith.subf %151, %150 : vector<8x1xf32>
    %153 = vector.shape_cast %152 : vector<8x1xf32> to vector<1x8x1xf32>
    %cst_38 = arith.constant dense<0.000000e+00> : vector<1xf32>
    %154 = vector.multi_reduction <add>, %153, %cst_38 [1, 2] : vector<1x8x1xf32> to vector<1xf32>
    %155 = vector.shape_cast %154 : vector<1xf32> to vector<1x1x1xf32>
    %156 = vector.extract %155[0, 0, 0] : f32 from vector<1x1x1xf32>
    %cst_39 = arith.constant 1.250000e-01 : f32
    %157 = arith.mulf %156, %cst_39 : f32
    %158 = arith.addf %157, %32 : f32
    %159 = tpu.iota {dimensions = array<i32: 0>} : vector<8x128xi32>
    %c0_i32 = arith.constant 0 : i32
    %160 = vector.broadcast %c0_i32 : i32 to vector<8x128xi32>
    %161 = arith.cmpi eq, %159, %160 : vector<8x128xi32>
    %c4_i32_40 = arith.constant 4 : i32
    %162 = vector.broadcast %c4_i32_40 : i32 to vector<8x128xi32>
    %163 = arith.cmpi eq, %127, %162 : vector<8x128xi32>
    %164 = arith.andi %161, %163 : vector<8x128xi1>
    %165 = vector.broadcast %158 : f32 to vector<8x128xf32>
    %166 = arith.select %164, %165, %131 : vector<8x128xi1>, vector<8x128xf32>
    %c0_41 = arith.constant 0 : index
    %c0_42 = arith.constant 0 : index
    %167 = vector.load %arg7[%c0_41, %c0_42] : memref<8x128xf32, #tpu.memory_space<vmem>>, vector<8x128xf32>
    tpu.vector_store %arg7[%c0_41, %c0_42], %166 {strides = array<i32>} : memref<8x128xf32, #tpu.memory_space<vmem>>, vector<8x128xf32>,
    return
  }
}

</mosaic_0001>

<bundles_post_ra>
// kernel: learner_query_step.1
= control target key start
LH: loop header
LB: loop body
LE: loop exit
PB: predicated region body
PF: predicated region fallthrough
CT: control target
= control target key end

     0   :  { %13 = vsyncpa [#allocation4], 0  ;;  %s1756_s0 = inlined_call_operand.vmem [shape: f32[8,2], index: 0, kind: input, shape index: {}]   ;;  %s1757_s1 = inlined_call_operand.hbm [shape: f32[64,128], index: 1, kind: input, shape index: {}]   ;;  %s1758_s2 = inlined_call_operand.hbm [shape: f32[128,128], index: 2, kind: input, shape index: {}]   ;;  %s1759_s3 = inlined_call_operand.hbm [shape: f32[128,128], index: 3, kind: input, shape index: {}]   ;;  %s1760_s4 = inlined_call_operand.hbm [shape: f32[128,128], index: 4, kind: input, shape index: {}]   ;;  %s1761_s5 = inlined_call_operand.vmem [shape: f32[2,128], index: 5, kind: input, shape index: {}]   ;;  %s1762_s6 = inlined_call_operand.<no memory space> [shape: f32[1,1], index: 6, kind: input, shape index: {}]   ;;  %s1763_s7 = inlined_call_operand.vmem [shape: f32[8,128], index: 7, kind: output, shape index: {}]  }
   0x1   :  { %14 = vsyncpa [#allocation6], 0 }
   0x2   :  { %15 = vsyncpa [#allocation9], 0  ;;  %s1261_s24 = smov [#allocation5]   ;;  %s1262_s26 = smov [#allocation3]  }
   0x3   :  { %s35_s25 = sshll.u32 %s1261_s24, 4  ;;  %s23_s27 = sshll.u32 %s1262_s26, 4  ;;  %s36_s25 = int_to_ptr.vmem [resolvable:$true] %s35_s25  ;;  %s1311_s27 = int_to_ptr.vmem [resolvable:$true] %s23_s27 }
   0x4   :  { %s1167_s30 = scalar_lea.hbm %s1758_s2, 2048 }
   0x5   :  { %p1168_p0 = scmp.ne.s32.totalorder %s1758_s2, %s1167_s30  ;;  %p1171_p1 = scmp.lt.u32.totalorder %s1167_s30, %s1758_s2 }
   0x7   :  { %p1173_p2 = pnand %p1171_p1, %p1168_p0 }
   0x9   :  { %1176 = shalt.err (!%p1173_p2)
}
   0xa   :  { %s1177_s12 = scalar_lea.vmem %s36_s25, 2048  ;;  %p1182_p4 = scmp.lt.s32.totalorder %s36_s25, %s36_s25 }
   0xb   :  { %p1178_p3 = scmp.ne.s32.totalorder %s36_s25, %s1177_s12  ;;  %p1183_p5 = scmp.lt.s32.totalorder %s1177_s12, %s1177_s12 }
   0xd   :  { %p1184_p6 = por %p1183_p5, %p1182_p4 }
   0xf   :  { %p1185_p7 = pnand %p1184_p6, %p1178_p3 }
  0x11   :  { %1188 = shalt.err (!%p1185_p7)
}
  0x12   :  { %s1263_s13 = smov 128   ;;  %s1264_s14 = smov 8  }
  0x13   :  { %41 = dma.hbm_to_vmem [thread:$0]  %s1758_s2, 2048, %s36_s25, [#allocation6], %s1263_s13, %s1263_s13, %s1264_s14  }
  0x14   :  { %s1189_s19 = scalar_lea.hbm %s1757_s1, 1024 }
  0x15   :  { %p1190_p8 = scmp.ne.s32.totalorder %s1757_s1, %s1189_s19  ;;  %p1193_p9 = scmp.lt.u32.totalorder %s1189_s19, %s1757_s1 }
  0x17   :  { %p1195_p10 = pnand %p1193_p9, %p1190_p8 }
  0x19   :  { %1198 = shalt.err (!%p1195_p10)
}
  0x1a   :  { %s1199_s24 = scalar_lea.vmem %s1311_s27, 1024  ;;  %p1204_p12 = scmp.lt.s32.totalorder %s1311_s27, %s1311_s27 }
  0x1b   :  { %p1200_p11 = scmp.ne.s32.totalorder %s1311_s27, %s1199_s24  ;;  %p1205_p13 = scmp.lt.s32.totalorder %s1199_s24, %s1199_s24 }
  0x1d   :  { %p1206_p0 = por %p1205_p13, %p1204_p12 }
  0x1f   :  { %p1207_p1 = pnand %p1206_p0, %p1200_p11 }
  0x21   :  { %1210 = shalt.err (!%p1207_p1)
}
  0x22   :  { %29 = dma.hbm_to_vmem [thread:$0]  %s1757_s1, 1024, %s1311_s27, [#allocation4], %s1263_s13, %s1263_s13, %s1264_s14  }
  0x23   :  { %s1265_s26 = smov [#allocation7]   ;;  %s1266_s29 = smov [#allocation8]  }
  0x24   :  { %s47_s28 = sshll.u32 %s1265_s26, 4  ;;  %s59_s30 = sshll.u32 %s1266_s29, 4  ;;  %s48_s28 = int_to_ptr.vmem [resolvable:$true] %s47_s28  ;;  %s1348_s30 = int_to_ptr.vmem [resolvable:$true] %s59_s30 }
  0x25   :  { %s1211_s10 = scalar_lea.hbm %s1759_s3, 2048 }
  0x26   :  { %p1212_p2 = scmp.ne.s32.totalorder %s1759_s3, %s1211_s10  ;;  %p1215_p3 = scmp.lt.u32.totalorder %s1211_s10, %s1759_s3 }
  0x28   :  { %p1217_p4 = pnand %p1215_p3, %p1212_p2 }
  0x2a   :  { %1220 = shalt.err (!%p1217_p4)
}
  0x2b   :  { %s1221_s1 = scalar_lea.vmem %s48_s28, 2048  ;;  %p1226_p6 = scmp.lt.s32.totalorder %s48_s28, %s48_s28 }
  0x2c   :  { %p1222_p5 = scmp.ne.s32.totalorder %s48_s28, %s1221_s1  ;;  %p1227_p7 = scmp.lt.s32.totalorder %s1221_s1, %s1221_s1 }
  0x2e   :  { %p1228_p8 = por %p1227_p7, %p1226_p6 }
  0x30   :  { %p1229_p9 = pnand %p1228_p8, %p1222_p5 }
  0x32   :  { %1232 = shalt.err (!%p1229_p9)
}
  0x33   :  { %53 = dma.hbm_to_vmem [thread:$0]  %s1759_s3, 2048, %s48_s28, [#allocation6], %s1263_s13, %s1263_s13, %s1264_s14  }
  0x34   :  { %s1233_s20 = scalar_lea.hbm %s1760_s4, 2048 }
  0x35   :  { %p1234_p10 = scmp.ne.s32.totalorder %s1760_s4, %s1233_s20  ;;  %p1237_p11 = scmp.lt.u32.totalorder %s1233_s20, %s1760_s4 }
  0x37   :  { %p1239_p12 = pnand %p1237_p11, %p1234_p10 }
  0x39   :  { %1242 = shalt.err (!%p1239_p12)
}
  0x3a   :  { %s1243_s2 = scalar_lea.vmem %s1348_s30, 2048  ;;  %p1248_p0 = scmp.lt.s32.totalorder %s1348_s30, %s1348_s30 }
  0x3b   :  { %p1244_p13 = scmp.ne.s32.totalorder %s1348_s30, %s1243_s2  ;;  %p1249_p1 = scmp.lt.s32.totalorder %s1243_s2, %s1243_s2 }
  0x3d   :  { %p1250_p2 = por %p1249_p1, %p1248_p0 }
  0x3f   :  { %p1251_p3 = pnand %p1250_p2, %p1244_p13 }
  0x41   :  { %1254 = shalt.err (!%p1251_p3)
}
  0x42   :  { %65 = dma.hbm_to_vmem [thread:$0]  %s1760_s4, 2048, %s1348_s30, [#allocation9], %s1263_s13, %s1263_s13, %s1264_s14  }
  0x43   :  { %1255 = dma.done.wait [#allocation4], 1024  }
  0x44   :  { %1256 = vsyncadd [#allocation4], 4294966272 }
  0x45   :  { %1257 = dma.done.wait [#allocation6], 4096  }
  0x46   :  { %1258 = vsyncadd [#allocation6], 4294963200 }
  0x47   :  { %1259 = dma.done.wait [#allocation9], 2048  }
  0x48   :  { %1260 = vsyncadd [#allocation9], 4294965248  ;;  %v1267_v0 = vmov 0.0   ;;  %v83_v1 = vld [vmem:[#allocation5] sm:$0xff]  ;;  %v84_v2 = vld [vmem:[#allocation5 + $0x8] sm:$0xff]  ;;  %vm1268_vm0 = vmmov 0  }
  0x49   :  { %960 = vmatprep.subr.bf16.mxu1 %v1267_v0  ;;  %v85_v3 = vld [vmem:[#allocation5 + $0x10] sm:$0xff]  ;;  %v132_v4 = vmul.f32 %v83_v1, %v83_v1  ;;  %v133_v5 = vmul.f32 %v84_v2, %v84_v2  ;;  %v291_v6 = vpack.c.bf16 %v84_v2, %v83_v1  ;;  %v86_v7 = vld [vmem:[#allocation5 + $0x18] sm:$0xff]  ;;  %v87_v10 = vld [vmem:[#allocation5 + $0x20] sm:$0xff]  ;;  %976 = vmatprep.mubr.msk.bf16.mxu1 %vm1268_vm0, %v1267_v0  ;;  %s268_s12 = smul.f32 0.5, %s1762_s6 }
  0x4a   :  { %v134_v8 = vmul.f32 %v85_v3, %v85_v3  ;;  %v292_v9 = vpack.c.bf16 %v86_v7, %v85_v3  ;;  %v88_v11 = vld [vmem:[#allocation5 + $0x28] sm:$0xff]  ;;  %v135_v13 = vmul.f32 %v86_v7, %v86_v7  ;;  %v136_v15 = vmul.f32 %v87_v10, %v87_v10  ;;  %v279_v17 = vld [vmem:[#allocation3] sm:$0xff]  ;;  %v89_v19 = vld [vmem:[#allocation5 + $0x30] sm:$0xff] }
  0x4b   :  { %v148_v12 = vadd.f32 %v133_v5, %v132_v4  ;;  %936 = vmatprep.subr.bf16.mxu0 %v291_v6  ;;  %v293_v16 = vpack.c.bf16 %v88_v11, %v87_v10  ;;  %v280_v18 = vld [vmem:[#allocation3 + $0x8] sm:$0xff]  ;;  %v90_v20 = vld [vmem:[#allocation5 + $0x38] sm:$0xff]  ;;  %v99_v21 = vld [vmem:[#allocation7] sm:$0xff]  ;;  %v137_v23 = vmul.f32 %v88_v11, %v88_v11  ;;  %v138_v32 = vmul.f32 %v89_v19, %v89_v19 }
  0x4c   :  { %937 = vmatpush3.bf16.msra.mxu0 %v291_v6  ;;  %v287_v24 = vpack.c.bf16 %v280_v18, %v279_v17  ;;  %v100_v25 = vld [vmem:[#allocation7 + $0x8] sm:$0xff]  ;;  %v172_v26 = vmul.f32 %v99_v21, %v99_v21  ;;  %v1386_v27 = vld [vmem:[#allocation7 + $0x10] sm:$0xff]  ;;  %v1388_v28 = vld [vmem:[#allocation7 + $0x18] sm:$0xff]  ;;  %v294_v33 = vpack.c.bf16 %v90_v20, %v89_v19  ;;  %v139_v39 = vmul.f32 %v90_v20, %v90_v20 }
  0x4d   :  { %v149_v14 = vadd.f32 %v148_v12, %v134_v8  ;;  %938 = vmatprep.subr.bf16.mxu0 %v292_v9  ;;  %v173_v29 = vmul.f32 %v100_v25, %v100_v25  ;;  %v1390_v30 = vpack.c.bf16 %v100_v25, %v99_v21  ;;  %v91_v34 = vld [vmem:[#allocation5 + $0x40] sm:$0xff]  ;;  %v92_v35 = vld [vmem:[#allocation5 + $0x48] sm:$0xff]  ;;  %v1397_v37 = vpack.c.bf16 %v1388_v28, %v1386_v27  ;;  %v93_v45 = vld [vmem:[#allocation5 + $0x50] sm:$0xff] }
  0x4e   :  { %952 = vmatprep.mubr.bf16.mxu0 %v287_v24  ;;  %v1400_v40 = vld [vmem:[#allocation7 + $0x20] sm:$0xff]  ;;  %v1402_v41 = vld [vmem:[#allocation7 + $0x28] sm:$0xff]  ;;  %v140_v43 = vmul.f32 %v91_v34, %v91_v34  ;;  %v295_v44 = vpack.c.bf16 %v92_v35, %v91_v34  ;;  %v94_v46 = vld [vmem:[#allocation5 + $0x58] sm:$0xff]  ;;  %v141_v49 = vmul.f32 %v92_v35, %v92_v35  ;;  %v142_v53 = vmul.f32 %v93_v45, %v93_v45 }
  0x4f   :  { %v150_v22 = vadd.f32 %v149_v14, %v135_v13  ;;  %v1392_v36 = vadd.f32 %v173_v29, %v172_v26  ;;  %961 = vmatpush3.bf16.msra.mxu1 %v1390_v30  ;;  %v1407_v47 = vpack.c.bf16 %v1402_v41, %v1400_v40  ;;  %v1410_v50 = vld [vmem:[#allocation7 + $0x30] sm:$0xff]  ;;  %v1412_v51 = vld [vmem:[#allocation7 + $0x38] sm:$0xff]  ;;  %v296_v54 = vpack.c.bf16 %v94_v46, %v93_v45  ;;  %v1414_v55 = vld [vmem:[#allocation5 + $0x60] sm:$0xff] }
  0x50   :  { %939 = vmatpush3.bf16.msra.mxu0 %v292_v9  ;;  %962 = vmatprep.subr.bf16.mxu1 %v1267_v0  ;;  %v1416_v56 = vld [vmem:[#allocation5 + $0x68] sm:$0xff]  ;;  %v1421_v57 = vpack.c.bf16 %v1412_v51, %v1410_v50  ;;  %v143_v59 = vmul.f32 %v94_v46, %v94_v46  ;;  %v1426_v62 = vld [vmem:[#allocation5 + $0x70] sm:$0xff]  ;;  %v1428_v63 = vld [vmem:[#allocation5 + $0x78] sm:$0xff]  ;;  %v1269_v19 = vmov 0   ;;  %v315_v21 = vlaneseq }
  0x51   :  { %v151_v31 = vadd.f32 %v150_v22, %v136_v15  ;;  %940 = vmatprep.subr.bf16.mxu0 %v293_v16  ;;  %v297_v61 = vpack.c.bf16 %v1416_v56, %v1414_v55  ;;  %v298_v2 = vpack.c.bf16 %v1428_v63, %v1426_v62  ;;  %v281_v3 = vld [vmem:[#allocation3 + $0x10] sm:$0xff]  ;;  %v282_v4 = vld [vmem:[#allocation3 + $0x18] sm:$0xff]  ;;  %v1445_v6 = vld [vmem:[#allocation7 + $0x40] sm:$0xff]  ;;  %1142 = vset.pattern.permute.xlu0 %v1269_v19 }
  0x52   :  { %v288_v5 = vpack.c.bf16 %v282_v4, %v281_v3  ;;  %v1447_v7 = vld [vmem:[#allocation7 + $0x48] sm:$0xff]  ;;  %v1456_v9 = vld [vmem:[#allocation7 + $0x50] sm:$0xff]  ;;  %v1458_v10 = vld [vmem:[#allocation7 + $0x58] sm:$0xff]  ;;  %1143 = vset.pattern.permute.xlu1 %v1269_v19  ;;  %v1505_v22 = vshrl.u32 %v315_v21, 7 }
  0x53   :  { %v152_v38 = vadd.f32 %v151_v31, %v137_v23  ;;  %963 = vmatpush3.bf16.msra.mxu1 %v1397_v37  ;;  %v1451_v8 = vpack.c.bf16 %v1447_v7, %v1445_v6  ;;  %v1463_v11 = vpack.c.bf16 %v1458_v10, %v1456_v9  ;;  %v1465_v12 = vld [vmem:[#allocation7 + $0x60] sm:$0xff]  ;;  %v1467_v13 = vld [vmem:[#allocation7 + $0x68] sm:$0xff]  ;;  %v1478_v15 = vld [vmem:[#allocation7 + $0x70] sm:$0xff] }
  0x54   :  { %941 = vmatpush3.bf16.msra.mxu0 %v293_v16  ;;  %964 = vmatprep.subr.bf16.mxu1 %v1267_v0  ;;  %v1474_v14 = vpack.c.bf16 %v1467_v13, %v1465_v12  ;;  %v1480_v16 = vld [vmem:[#allocation7 + $0x78] sm:$0xff]  ;;  %v1498_v18 = vld [vmem:[%s1756_s0] sm:$0xff]  ;;  %v317_v23 = vsub.s32 0, %v1505_v22 }
  0x55   :  { %v153_v42 = vadd.f32 %v152_v38, %v138_v32  ;;  %942 = vmatprep.subr.bf16.mxu0 %v294_v33  ;;  %v1486_v17 = vpack.c.bf16 %v1480_v16, %v1478_v15  ;;  %vm844_vm1 = vcmp.gt.f32.partialorder %v1498_v18, 1.0  ;;  %v1511_v24 = vld [vmem:[%s1761_s5] sm:$0x3]  ;;  %vm845_vm2 = vcmp.gt.f32.partialorder %v1498_v18, 2.0 }
  0x56   :  { %v431_v20 = vsel %vm844_vm1, 1, %v1269_v19  ;;  %v1514_v25 = vrot.slane %v1511_v24, %v317_v23  ;;  %v283_v38 = vld [vmem:[#allocation3 + $0x20] sm:$0xff]  ;;  %v482_v46 = vsel %vm845_vm2, 1, %v1269_v19  ;;  %vm846_vm3 = vcmp.gt.f32.partialorder %v1498_v18, 3.0 }
  0x57   :  { %v154_v48 = vadd.f32 %v153_v42, %v139_v39  ;;  %965 = vmatpush3.bf16.msra.mxu1 %v1407_v47  ;;  %433 = vperm.xlu0 %1142, %v431_v20   ;;  %v284_v39 = vld [vmem:[#allocation3 + $0x28] sm:$0xff]  ;;  %vm847_vm6 = vcmp.gt.f32.partialorder %v1498_v18, 4.0  ;;  %vm848_vm8 = vcmp.gt.f32.partialorder %v1498_v18, 5.0  ;;  %vm849_vm10 = vcmp.gt.f32.partialorder %v1498_v18, 6.0 }
  0x58   :  { %943 = vmatpush3.bf16.msra.mxu0 %v294_v33  ;;  %966 = vmatprep.subr.bf16.mxu1 %v1267_v0  ;;  %v289_v42 = vpack.c.bf16 %v284_v39, %v283_v38  ;;  %vm850_vm12 = vcmp.gt.f32.partialorder %v1498_v18, 7.0  ;;  %vm255_vm1 = vcmask 1041408   ;;  %vm816_vm2 = vcmask 7168  }
  0x59   :  { %v155_v52 = vadd.f32 %v154_v48, %v140_v43  ;;  %944 = vmatprep.subr.bf16.mxu0 %v295_v44  ;;  %v285_v43 = vld [vmem:[#allocation3 + $0x30] sm:$0xff] }
  0x5b   :  { %v156_v58 = vadd.f32 %v155_v52, %v141_v49  ;;  %967 = vmatpush3.bf16.msra.mxu1 %v1421_v57  ;;  %484 = vperm.xlu0 %1142, %v482_v46  }
  0x5c   :  { %945 = vmatpush3.bf16.msra.mxu0 %v295_v44  ;;  %968 = vmatprep.subr.bf16.mxu1 %v1267_v0  ;;  %v286_v44 = vld [vmem:[#allocation3 + $0x38] sm:$0xff] }
  0x5d   :  { %v157_v60 = vadd.f32 %v156_v58, %v142_v53  ;;  %946 = vmatprep.subr.bf16.mxu0 %v296_v54  ;;  %v290_v45 = vpack.c.bf16 %v286_v44, %v285_v43 }
  0x5f   :  { %v1431_v1 = vadd.f32 %v157_v60, %v143_v59  ;;  %969 = vmatpush3.bf16.msra.mxu1 %v1451_v8 }
  0x60   :  { %947 = vmatpush3.bf16.msra.mxu0 %v296_v54  ;;  %970 = vmatprep.subr.bf16.mxu1 %v1267_v0 }
  0x61   :  { %948 = vmatprep.subr.bf16.mxu0 %v297_v61 }
  0x63   :  { %971 = vmatpush3.bf16.msra.mxu1 %v1463_v11 }
  0x64   :  { %949 = vmatpush3.bf16.msra.mxu0 %v297_v61  ;;  %972 = vmatprep.subr.bf16.mxu1 %v1267_v0 }
  0x65   :  { %950 = vmatprep.subr.bf16.mxu0 %v298_v2 }
  0x67   :  { %973 = vmatpush3.bf16.msra.mxu1 %v1474_v14 }
  0x68   :  { %951 = vmatpush3.bf16.msra.mxu0 %v298_v2  ;;  %974 = vmatprep.subr.bf16.mxu1 %v1267_v0 }
  0x69   :  { %980 = vmatprep.subr.bf16.mxu0 %v1267_v0 }
  0x6b   :  { %953 = vmatmul.mubr.bf16.vlgmr.msra.gmra.mrb[0].mxu0 %v288_v5  ;;  %975 = vmatpush3.bf16.msra.mxu1 %v1486_v17  ;;  %v533_v5 = vsel %vm846_vm3, 1, %v1269_v19 }
  0x6c   :  { %981 = vmatpush3.bf16.msra.mxu0 %v1390_v30  ;;  %1000 = vmatprep.subr.bf16.mxu1 %v1267_v0 }
  0x6d   :  { %982 = vmatprep.subr.bf16.mxu0 %v1267_v0  ;;  %956 = vmatprep.mubr.bf16.mxu0 %v289_v42 }
  0x6e   :  { %535 = vperm.xlu1 %1143, %v533_v5  }
  0x70   :  { %983 = vmatpush3.bf16.msra.mxu0 %v1397_v37 }
  0x71   :  { %984 = vmatprep.subr.bf16.mxu0 %v1267_v0 }
  0x73   :  { %957 = vmatmul.mubr.bf16.gmra.mrb[4].mxu0 %v290_v45 }
  0x74   :  { %985 = vmatpush3.bf16.msra.mxu0 %v1407_v47  ;;  %996 = vmatprep.mubr.msk.bf16.mxu0 %vm1268_vm0, %v1267_v0 }
  0x75   :  { %986 = vmatprep.subr.bf16.mxu0 %v1267_v0 }
  0x78   :  { %987 = vmatpush3.bf16.msra.mxu0 %v1421_v57 }
  0x79   :  { %988 = vmatprep.subr.bf16.mxu0 %v1267_v0 }
  0x7c   :  { %989 = vmatpush3.bf16.msra.mxu0 %v1451_v8 }
  0x7d   :  { %990 = vmatprep.subr.bf16.mxu0 %v1267_v0 }
  0x80   :  { %991 = vmatpush3.bf16.msra.mxu0 %v1463_v11 }
  0x81   :  { %992 = vmatprep.subr.bf16.mxu0 %v1267_v0 }
  0x84   :  { %993 = vmatpush3.bf16.msra.mxu0 %v1474_v14 }
  0x85   :  { %994 = vmatprep.subr.bf16.mxu0 %v1267_v0 }
  0x88   :  { %995 = vmatpush3.bf16.msra.mxu0 %v1486_v17 }
  0x89   :  { %1020 = vmatprep.subr.bf16.mxu0 %v1267_v0 }
  0xd6   :  { %v434_v38 = vpop.permute.xlu0 %433 }
  0xd7   :  { %vm435_vm4 = vcmp.eq.s32.totalorder %v434_v38, 1 }
  0xda   :  { %v485_v42 = vpop.permute.xlu0 %484 }
  0xdb   :  { %vm486_vm5 = vcmp.eq.s32.totalorder %v485_v42, 1 }
 0x13e   :  { %v1516_v26 = vpop.f32.mrb[0].mxu0 }
 0x13f   :  { %v353_v29 = vpop.f32.mrb[1].mxu0  ;;  %v362_v20 = vadd.f32 %v1516_v26, %v1514_v25  ;;  %v584_v26 = vsel %vm847_vm6, 1, %v1269_v19 }
 0x140   :  { %v354_v31 = vadd.f32 %v353_v29, %v1514_v25  ;;  %v1519_v32 = vpop.f32.mrb[2].mxu0  ;;  %586 = vperm.xlu1 %1143, %v584_v26  }
 0x141   :  { %v356_v33 = vpop.f32.mrb[3].mxu0 }
 0x142   :  { %1145 = vtanh.f32 %v354_v31  ;;  %v357_v48 = vadd.f32 %v356_v33, %v1514_v25 }
 0x146   :  { %v1566_v61 = vpop.f32.mrb[4].mxu0 }
 0x147   :  { %v1568_v2 = vpop.f32.mrb[5].mxu0 }
 0x148   :  { %v1570_v3 = vpop.f32.mrb[6].mxu0 }
 0x149   :  { %v1572_v4 = vpop.f32.mrb[7].mxu0 }
 0x14c   :  { %v1521_v34 = vpop.eup %1145 }
 0x14d   :  { %v386_v35 = vpack.c.bf16 %v1521_v34, %v1521_v34 }
 0x14f   :  { %977 = vmatmul.mubr.bf16.vlgmr.msra.gmra.mrb[0].mxu1 %v386_v35 }
 0x150   :  { %1001 = vmatpush3.bf16.msra.mxu1 %v1390_v30  ;;  %1016 = vmatprep.mubr.msk.bf16.mxu1 %vm1268_vm0, %v1267_v0 }
 0x151   :  { %1002 = vmatprep.subr.bf16.mxu1 %v1267_v0 }
 0x154   :  { %1003 = vmatpush3.bf16.msra.mxu1 %v1397_v37 }
 0x155   :  { %1004 = vmatprep.subr.bf16.mxu1 %v1267_v0 }
 0x158   :  { %1005 = vmatpush3.bf16.msra.mxu1 %v1407_v47 }
 0x159   :  { %1006 = vmatprep.subr.bf16.mxu1 %v1267_v0 }
 0x15c   :  { %1007 = vmatpush3.bf16.msra.mxu1 %v1421_v57 }
 0x15d   :  { %1008 = vmatprep.subr.bf16.mxu1 %v1267_v0 }
 0x160   :  { %1009 = vmatpush3.bf16.msra.mxu1 %v1451_v8 }
 0x161   :  { %1010 = vmatprep.subr.bf16.mxu1 %v1267_v0 }
 0x164   :  { %1011 = vmatpush3.bf16.msra.mxu1 %v1463_v11 }
 0x165   :  { %1012 = vmatprep.subr.bf16.mxu1 %v1267_v0 }
 0x168   :  { %1013 = vmatpush3.bf16.msra.mxu1 %v1474_v14 }
 0x169   :  { %1014 = vmatprep.subr.bf16.mxu1 %v1267_v0 }
 0x16c   :  { %1015 = vmatpush3.bf16.msra.mxu1 %v1486_v17 }
 0x16d   :  { %1040 = vmatprep.subr.bf16.mxu1 %v1267_v0 }
 0x222   :  { %v421_v49 = vpop.f32.mrb[0].mxu1 }
 0x223   :  { %v427_v52 = vadd.f32 %v421_v49, %v357_v48  ;;  %v978_v53 = vpop.f32.mrb[1].mxu1 }
 0x224   :  { %v424_v54 = vpop.f32.mrb[2].mxu1 }
 0x225   :  { %1147 = vtanh.f32 %v427_v52  ;;  %v979_v58 = vpop.f32.mrb[3].mxu1 }
 0x22f   :  { %v1148_v59 = vpop.eup %1147 }
 0x230   :  { %v437_v60 = vpack.c.bf16 %v1148_v59, %v1148_v59  ;;  %v430_v39 = vmax.f32 %v1521_v34, %v1148_v59  ;;  %v536_v59 = vpop.permute.xlu1 %535 }
 0x231   :  { %vm537_vm7 = vcmp.eq.s32.totalorder %v536_v59, 1 }
 0x232   :  { %997 = vmatmul.mubr.bf16.vlgmr.msra.gmra.mrb[8].mxu0 %v437_v60  ;;  %v436_v44 = vsel %vm435_vm4, %v430_v39, %v1521_v34  ;;  %v365_v34 = vadd.f32 %v1519_v32, %v1514_v25  ;;  %v635_v32 = vsel %vm848_vm8, 1, %v1269_v19 }
 0x233   :  { %1021 = vmatpush3.bf16.msra.mxu0 %v1390_v30  ;;  %1036 = vmatprep.mubr.msk.bf16.mxu0 %vm1268_vm0, %v1267_v0 }
 0x234   :  { %1022 = vmatprep.subr.bf16.mxu0 %v1267_v0  ;;  %637 = vperm.xlu0 %1142, %v635_v32   ;;  %v587_v42 = vpop.permute.xlu1 %586 }
 0x235   :  { %vm588_vm9 = vcmp.eq.s32.totalorder %v587_v42, 1 }
 0x237   :  { %1023 = vmatpush3.bf16.msra.mxu0 %v1397_v37 }
 0x238   :  { %1024 = vmatprep.subr.bf16.mxu0 %v1267_v0 }
 0x23b   :  { %1025 = vmatpush3.bf16.msra.mxu0 %v1407_v47 }
 0x23c   :  { %1026 = vmatprep.subr.bf16.mxu0 %v1267_v0 }
 0x23f   :  { %1027 = vmatpush3.bf16.msra.mxu0 %v1421_v57 }
 0x240   :  { %1028 = vmatprep.subr.bf16.mxu0 %v1267_v0 }
 0x243   :  { %1029 = vmatpush3.bf16.msra.mxu0 %v1451_v8 }
 0x244   :  { %1030 = vmatprep.subr.bf16.mxu0 %v1267_v0 }
 0x247   :  { %1031 = vmatpush3.bf16.msra.mxu0 %v1463_v11 }
 0x248   :  { %1032 = vmatprep.subr.bf16.mxu0 %v1267_v0 }
 0x24b   :  { %1033 = vmatpush3.bf16.msra.mxu0 %v1474_v14 }
 0x24c   :  { %1034 = vmatprep.subr.bf16.mxu0 %v1267_v0 }
 0x24f   :  { %1035 = vmatpush3.bf16.msra.mxu0 %v1486_v17 }
 0x250   :  { %1060 = vmatprep.subr.bf16.mxu0 %v1267_v0 }
 0x305   :  { %v472_v23 = vpop.f32.mrb[8].mxu0 }
 0x306   :  { %v478_v29 = vadd.f32 %v472_v23, %v362_v20  ;;  %v998_v31 = vpop.f32.mrb[9].mxu0 }
 0x307   :  { %v475_v33 = vpop.f32.mrb[10].mxu0 }
 0x308   :  { %1149 = vtanh.f32 %v478_v29  ;;  %v999_v35 = vpop.f32.mrb[11].mxu0  ;;  %v370_v29 = vadd.f32 %v1568_v2, %v1514_v25 }
 0x312   :  { %v1150_v43 = vpop.eup %1149 }
 0x313   :  { %v481_v45 = vmax.f32 %v436_v44, %v1150_v43  ;;  %v488_v46 = vpack.c.bf16 %v1150_v43, %v1150_v43 }
 0x315   :  { %v487_v48 = vsel %vm486_vm5, %v481_v45, %v436_v44  ;;  %1017 = vmatmul.mubr.bf16.vlgmr.msra.gmra.mrb[4].mxu1 %v488_v46  ;;  %vm831_vm5 = vcmp.eq.s32.totalorder %v1505_v22, 0 }
 0x316   :  { %1041 = vmatpush3.bf16.msra.mxu1 %v1390_v30  ;;  %1056 = vmatprep.mubr.msk.bf16.mxu1 %vm1268_vm0, %v1267_v0 }
 0x317   :  { %1042 = vmatprep.subr.bf16.mxu1 %v1267_v0 }
 0x31a   :  { %1043 = vmatpush3.bf16.msra.mxu1 %v1397_v37 }
 0x31b   :  { %1044 = vmatprep.subr.bf16.mxu1 %v1267_v0 }
 0x31e   :  { %1045 = vmatpush3.bf16.msra.mxu1 %v1407_v47 }
 0x31f   :  { %1046 = vmatprep.subr.bf16.mxu1 %v1267_v0 }
 0x322   :  { %1047 = vmatpush3.bf16.msra.mxu1 %v1421_v57 }
 0x323   :  { %1048 = vmatprep.subr.bf16.mxu1 %v1267_v0 }
 0x326   :  { %1049 = vmatpush3.bf16.msra.mxu1 %v1451_v8 }
 0x327   :  { %1050 = vmatprep.subr.bf16.mxu1 %v1267_v0 }
 0x32a   :  { %1051 = vmatpush3.bf16.msra.mxu1 %v1463_v11 }
 0x32b   :  { %1052 = vmatprep.subr.bf16.mxu1 %v1267_v0 }
 0x32e   :  { %1053 = vmatpush3.bf16.msra.mxu1 %v1474_v14 }
 0x32f   :  { %1054 = vmatprep.subr.bf16.mxu1 %v1267_v0 }
 0x332   :  { %1055 = vmatpush3.bf16.msra.mxu1 %v1486_v17 }
 0x333   :  { %1080 = vmatprep.subr.bf16.mxu1 %v1267_v0 }
 0x3e8   :  { %v523_v49 = vpop.f32.mrb[4].mxu1 }
 0x3e9   :  { %v529_v52 = vadd.f32 %v523_v49, %v365_v34  ;;  %v1018_v53 = vpop.f32.mrb[5].mxu1  ;;  %v115_v49 = vld [vmem:[#allocation8] sm:$0xff] }
 0x3ea   :  { %v526_v54 = vpop.f32.mrb[6].mxu1  ;;  %v737_v53 = vsel %vm850_vm12, 1, %v1269_v19 }
 0x3eb   :  { %1151 = vtanh.f32 %v529_v52  ;;  %v1019_v58 = vpop.f32.mrb[7].mxu1  ;;  %v117_v52 = vld [vmem:[#allocation8 + $0x10] sm:$0xff]  ;;  %v213_v54 = vmul.f32 %v115_v49, %v115_v49  ;;  %739 = vperm.xlu0 %1142, %v737_v53   ;;  %v1658_v53 = vld [vmem:[#allocation8 + $0x58] sm:$0xff] }
 0x3f5   :  { %v1152_v60 = vpop.eup %1151 }
 0x3f6   :  { %v532_v5 = vmax.f32 %v487_v48, %v1152_v60  ;;  %v539_v20 = vpack.c.bf16 %v1152_v60, %v1152_v60  ;;  %v118_v60 = vld [vmem:[#allocation8 + $0x18] sm:$0xff] }
 0x3f7   :  { %v308_v32 = vpack.c.bf16 %v118_v60, %v117_v52 }
 0x3f8   :  { %v538_v23 = vsel %vm537_vm7, %v532_v5, %v487_v48  ;;  %1037 = vmatmul.mubr.bf16.vlgmr.msra.gmra.mrb[12].mxu0 %v539_v20  ;;  %v638_v48 = vpop.permute.xlu0 %637  ;;  %v215_v5 = vmul.f32 %v117_v52, %v117_v52  ;;  %v1656_v52 = vld [vmem:[#allocation8 + $0x50] sm:$0xff] }
 0x3f9   :  { %1061 = vmatpush3.bf16.msra.mxu0 %v1390_v30  ;;  %1076 = vmatprep.mubr.msk.bf16.mxu0 %vm1268_vm0, %v1267_v0  ;;  %vm639_vm11 = vcmp.eq.s32.totalorder %v638_v48, 1 }
 0x3fa   :  { %1062 = vmatprep.subr.bf16.mxu0 %v1267_v0 }
 0x3fd   :  { %1063 = vmatpush3.bf16.msra.mxu0 %v1397_v37 }
 0x3fe   :  { %1064 = vmatprep.subr.bf16.mxu0 %v1267_v0 }
 0x401   :  { %1065 = vmatpush3.bf16.msra.mxu0 %v1407_v47 }
 0x402   :  { %1066 = vmatprep.subr.bf16.mxu0 %v1267_v0 }
 0x405   :  { %1067 = vmatpush3.bf16.msra.mxu0 %v1421_v57 }
 0x406   :  { %1068 = vmatprep.subr.bf16.mxu0 %v1267_v0 }
 0x409   :  { %1069 = vmatpush3.bf16.msra.mxu0 %v1451_v8 }
 0x40a   :  { %1070 = vmatprep.subr.bf16.mxu0 %v1267_v0 }
 0x40d   :  { %1071 = vmatpush3.bf16.msra.mxu0 %v1463_v11 }
 0x40e   :  { %1072 = vmatprep.subr.bf16.mxu0 %v1267_v0 }
 0x411   :  { %1073 = vmatpush3.bf16.msra.mxu0 %v1474_v14 }
 0x412   :  { %1074 = vmatprep.subr.bf16.mxu0 %v1267_v0 }
 0x415   :  { %1075 = vmatpush3.bf16.msra.mxu0 %v1486_v17 }
 0x416   :  { %1100 = vmatprep.subr.bf16.mxu0 %v1267_v0 }
 0x4cb   :  { %v574_v31 = vpop.f32.mrb[12].mxu0 }
 0x4cc   :  { %v580_v33 = vadd.f32 %v574_v31, %v370_v29  ;;  %v1038_v35 = vpop.f32.mrb[13].mxu0  ;;  %v119_v29 = vld [vmem:[#allocation8 + $0x20] sm:$0xff]  ;;  %v120_v31 = vld [vmem:[#allocation8 + $0x28] sm:$0xff] }
 0x4cd   :  { %v577_v38 = vpop.f32.mrb[14].mxu0  ;;  %v217_v35 = vmul.f32 %v119_v29, %v119_v29 }
 0x4ce   :  { %1153 = vtanh.f32 %v580_v33  ;;  %v1039_v39 = vpop.f32.mrb[15].mxu0 }
 0x4cf   :  { %v218_v39 = vmul.f32 %v120_v31, %v120_v31 }
 0x4d8   :  { %v1154_v43 = vpop.eup %1153 }
 0x4d9   :  { %v583_v44 = vmax.f32 %v538_v23, %v1154_v43  ;;  %v590_v45 = vpack.c.bf16 %v1154_v43, %v1154_v43 }
 0x4db   :  { %v589_v46 = vsel %vm588_vm9, %v583_v44, %v538_v23  ;;  %1057 = vmatmul.mubr.bf16.vlgmr.msra.gmra.mrb[8].mxu1 %v590_v45  ;;  %v216_v23 = vmul.f32 %v118_v60, %v118_v60  ;;  %v378_v44 = vadd.f32 %v1566_v61, %v1514_v25  ;;  %v123_v61 = vld [vmem:[#allocation8 + $0x40] sm:$0xff]  ;;  %v1670_v60 = vld [vmem:[#allocation8 + $0x70] sm:$0xff] }
 0x4dc   :  { %1081 = vmatpush3.bf16.msra.mxu1 %v1390_v30  ;;  %1096 = vmatprep.mubr.msk.bf16.mxu1 %vm1268_vm0, %v1267_v0  ;;  %v686_v30 = vsel %vm849_vm10, 1, %v1269_v19  ;;  %v309_v19 = vpack.c.bf16 %v120_v31, %v119_v29  ;;  %v221_v31 = vmul.f32 %v123_v61, %v123_v61 }
 0x4dd   :  { %1082 = vmatprep.subr.bf16.mxu1 %v1267_v0  ;;  %688 = vperm.xlu1 %1143, %v686_v30  }
 0x4e0   :  { %1083 = vmatpush3.bf16.msra.mxu1 %v1397_v37  ;;  %v373_v37 = vadd.f32 %v1572_v4, %v1514_v25  ;;  %v116_v4 = vld [vmem:[#allocation8 + $0x8] sm:$0xff] }
 0x4e1   :  { %1084 = vmatprep.subr.bf16.mxu1 %v1267_v0  ;;  %v214_v58 = vmul.f32 %v116_v4, %v116_v4  ;;  %v307_v59 = vpack.c.bf16 %v116_v4, %v115_v49  ;;  %v124_v49 = vld [vmem:[#allocation8 + $0x48] sm:$0xff] }
 0x4e2   :  { %v311_v4 = vpack.c.bf16 %v124_v49, %v123_v61 }
 0x4e3   :  { %v229_v20 = vadd.f32 %v214_v58, %v213_v54  ;;  %v1663_v54 = vld [vmem:[#allocation8 + $0x60] sm:$0xff]  ;;  %v1665_v58 = vld [vmem:[#allocation8 + $0x68] sm:$0xff] }
 0x4e4   :  { %1085 = vmatpush3.bf16.msra.mxu1 %v1407_v47 }
 0x4e5   :  { %1086 = vmatprep.subr.bf16.mxu1 %v1267_v0  ;;  %v230_v33 = vadd.f32 %v229_v20, %v215_v5  ;;  %v1672_v5 = vld [vmem:[#allocation8 + $0x78] sm:$0xff] }
 0x4e7   :  { %v231_v38 = vadd.f32 %v230_v33, %v216_v23 }
 0x4e8   :  { %1087 = vmatpush3.bf16.msra.mxu1 %v1421_v57 }
 0x4e9   :  { %1088 = vmatprep.subr.bf16.mxu1 %v1267_v0  ;;  %v232_v42 = vadd.f32 %v231_v38, %v217_v35  ;;  %v222_v35 = vmul.f32 %v124_v49, %v124_v49 }
 0x4eb   :  { %v233_v43 = vadd.f32 %v232_v42, %v218_v39 }
 0x4ec   :  { %1089 = vmatpush3.bf16.msra.mxu1 %v1451_v8 }
 0x4ed   :  { %1090 = vmatprep.subr.bf16.mxu1 %v1267_v0 }
 0x4f0   :  { %1091 = vmatpush3.bf16.msra.mxu1 %v1463_v11 }
 0x4f1   :  { %1092 = vmatprep.subr.bf16.mxu1 %v1267_v0 }
 0x4f4   :  { %1093 = vmatpush3.bf16.msra.mxu1 %v1474_v14 }
 0x4f5   :  { %1094 = vmatprep.subr.bf16.mxu1 %v1267_v0 }
 0x4f8   :  { %1095 = vmatpush3.bf16.msra.mxu1 %v1486_v17 }
 0x5ae   :  { %v625_v47 = vpop.f32.mrb[8].mxu1 }
 0x5af   :  { %v631_v57 = vadd.f32 %v625_v47, %v373_v37  ;;  %v1058_v8 = vpop.f32.mrb[9].mxu1 }
 0x5b0   :  { %v628_v11 = vpop.f32.mrb[10].mxu1 }
 0x5b1   :  { %1155 = vtanh.f32 %v631_v57  ;;  %v1059_v2 = vpop.f32.mrb[11].mxu1  ;;  %v689_v57 = vpop.permute.xlu1 %688 }
 0x5b2   :  { %vm690_vm13 = vcmp.eq.s32.totalorder %v689_v57, 1 }
 0x5bb   :  { %v1156_v14 = vpop.eup %1155 }
 0x5bc   :  { %v634_v26 = vmax.f32 %v589_v46, %v1156_v14  ;;  %v641_v34 = vpack.c.bf16 %v1156_v14, %v1156_v14  ;;  %v121_v14 = vld [vmem:[#allocation8 + $0x30] sm:$0xff] }
 0x5bd   :  { %v219_v20 = vmul.f32 %v121_v14, %v121_v14 }
 0x5be   :  { %v640_v17 = vsel %vm639_vm11, %v634_v26, %v589_v46  ;;  %1077 = vmatmul.mubr.bf16.vlgmr.msra.gmra.mrb[16].mxu0 %v641_v34  ;;  %v122_v26 = vld [vmem:[#allocation8 + $0x38] sm:$0xff] }
 0x5bf   :  { %1116 = vmatprep.mubr.msk.bf16.mxu0 %vm1268_vm0, %v1267_v0  ;;  %1101 = vmatpush3.bf16.msra.mxu0 %v307_v59  ;;  %v310_v34 = vpack.c.bf16 %v122_v26, %v121_v14  ;;  %v313_v59 = vpack.c.bf16 %v1665_v58, %v1663_v54  ;;  %v220_v23 = vmul.f32 %v122_v26, %v122_v26 }
 0x5c0   :  { %1102 = vmatprep.subr.bf16.mxu0 %v1267_v0  ;;  %v234_v29 = vadd.f32 %v233_v43, %v219_v20  ;;  %v175_v20 = vmul.f32 %v1388_v28, %v1388_v28 }
 0x5c2   :  { %v235_v33 = vadd.f32 %v234_v29, %v220_v23 }
 0x5c3   :  { %1103 = vmatpush3.bf16.msra.mxu0 %v308_v32  ;;  %v314_v32 = vpack.c.bf16 %v1672_v5, %v1670_v60 }
 0x5c4   :  { %1104 = vmatprep.subr.bf16.mxu0 %v1267_v0  ;;  %v236_v38 = vadd.f32 %v235_v33, %v221_v31  ;;  %v177_v31 = vmul.f32 %v1402_v41, %v1402_v41  ;;  %v181_v41 = vmul.f32 %v1447_v7, %v1447_v7  ;;  %v184_v7 = vmul.f32 %v1465_v12, %v1465_v12 }
 0x5c6   :  { %v1676_v39 = vadd.f32 %v236_v38, %v222_v35  ;;  %v178_v35 = vmul.f32 %v1410_v50, %v1410_v50  ;;  %v145_v50 = vmul.f32 %v1416_v56, %v1416_v56  ;;  %v147_v56 = vmul.f32 %v1428_v63, %v1428_v63 }
 0x5c7   :  { %1105 = vmatpush3.bf16.msra.mxu0 %v309_v19  ;;  %v381_v19 = vadd.f32 %v1570_v3, %v1514_v25  ;;  %v223_v63 = vmul.f32 %v1656_v52, %v1656_v52 }
 0x5c8   :  { %1106 = vmatprep.subr.bf16.mxu0 %v1267_v0 }
 0x5cb   :  { %1107 = vmatpush3.bf16.msra.mxu0 %v310_v34 }
 0x5cc   :  { %1108 = vmatprep.subr.bf16.mxu0 %v1267_v0 }
 0x5cf   :  { %1109 = vmatpush3.bf16.msra.mxu0 %v311_v4 }
 0x5d0   :  { %1110 = vmatprep.subr.bf16.mxu0 %v1267_v0 }
 0x691   :  { %v676_v45 = vpop.f32.mrb[16].mxu0 }
 0x692   :  { %v682_v46 = vadd.f32 %v676_v45, %v378_v44  ;;  %v1078_v30 = vpop.f32.mrb[17].mxu0 }
 0x693   :  { %v679_v37 = vpop.f32.mrb[18].mxu0 }
 0x694   :  { %1157 = vtanh.f32 %v682_v46  ;;  %v1079_v47 = vpop.f32.mrb[19].mxu0  ;;  %v740_v37 = vpop.permute.xlu0 %739 }
 0x695   :  { %vm741_vm14 = vcmp.eq.s32.totalorder %v740_v37, 1 }
 0x69e   :  { %v1158_v8 = vpop.eup %1157 }
 0x69f   :  { %v685_v11 = vmax.f32 %v640_v17, %v1158_v8  ;;  %v692_v2 = vpack.c.bf16 %v1158_v8, %v1158_v8 }
 0x6a1   :  { %v691_v48 = vsel %vm690_vm13, %v685_v11, %v640_v17  ;;  %1097 = vmatmul.mubr.bf16.vlgmr.msra.gmra.mrb[12].mxu1 %v692_v2  ;;  %v312_v17 = vpack.c.bf16 %v1658_v53, %v1656_v52  ;;  %v746_v11 = vsub.s32 1, %v1505_v22  ;;  %v1682_v2 = vand.u32 127, %v315_v21 }
 0x6a2   :  { %v174_v21 = vmul.f32 %v1386_v27, %v1386_v27 }
 0x6a3   :  { %1111 = vmatpush3.bf16.msra.mxu0 %v312_v17  ;;  %v747_v25 = vrot.slane %v1511_v24, %v746_v11  ;;  %vm790_vm15 = vcmp.lt.s32.totalorder %v1682_v2, 4  ;;  %vm832_vm6 = vcmp.eq.s32.totalorder %v1682_v2, 4 }
 0x6a4   :  { %1112 = vmatprep.subr.bf16.mxu0 %v1267_v0  ;;  %v189_v23 = vadd.f32 %v1392_v36, %v174_v21  ;;  %v180_v36 = vmul.f32 %v1445_v6, %v1445_v6  ;;  %v183_v6 = vmul.f32 %v1458_v10, %v1458_v10  ;;  %v186_v10 = vmul.f32 %v1478_v15, %v1478_v15  ;;  %vm833_vm7 = vmand %vm831_vm5, %vm832_vm6 }
 0x6a6   :  { %v190_v29 = vadd.f32 %v189_v23, %v175_v20 }
 0x6a7   :  { %1113 = vmatpush3.bf16.msra.mxu0 %v313_v59 }
 0x6a8   :  { %1114 = vmatprep.subr.bf16.mxu0 %v1267_v0 }
 0x6ab   :  { %1115 = vmatpush3.bf16.msra.mxu0 %v314_v32  ;;  %v176_v32 = vmul.f32 %v1400_v40, %v1400_v40  ;;  %v144_v40 = vmul.f32 %v1414_v55, %v1414_v55  ;;  %v146_v55 = vmul.f32 %v1426_v62, %v1426_v62  ;;  %v187_v62 = vmul.f32 %v1480_v16, %v1480_v16 }
 0x6ac   :  { %v803_v16 = vcvt.s32.f32 %v1682_v2 }
 0x6ad   :  { %v191_v33 = vadd.f32 %v190_v29, %v176_v32 }
 0x6af   :  { %v192_v38 = vadd.f32 %v191_v33, %v177_v31 }
 0x6b1   :  { %v193_v28 = vadd.f32 %v192_v38, %v178_v35 }
 0x774   :  { %v727_v42 = vpop.f32.mrb[12].mxu1 }
 0x775   :  { %v733_v44 = vadd.f32 %v727_v42, %v381_v19  ;;  %v1098_v45 = vpop.f32.mrb[13].mxu1  ;;  %v179_v19 = vmul.f32 %v1412_v51, %v1412_v51 }
 0x776   :  { %v730_v46 = vpop.f32.mrb[14].mxu1  ;;  %v182_v45 = vmul.f32 %v1456_v9, %v1456_v9  ;;  %v185_v9 = vmul.f32 %v1467_v13, %v1467_v13  ;;  %v224_v13 = vmul.f32 %v1658_v53, %v1658_v53  ;;  %v227_v53 = vmul.f32 %v1670_v60, %v1670_v60 }
 0x777   :  { %1159 = vtanh.f32 %v733_v44  ;;  %v1099_v30 = vpop.f32.mrb[15].mxu1  ;;  %v194_v42 = vadd.f32 %v193_v28, %v179_v19  ;;  %v159_v46 = vadd.f32 %v1431_v1, %v144_v40  ;;  %v254_v60 = vmul.f32 %v1511_v24, %v1511_v24 }
 0x779   :  { %v195_v44 = vadd.f32 %v194_v42, %v180_v36  ;;  %v160_v37 = vadd.f32 %v159_v46, %v145_v50  ;;  %v256_v19 = vsel %vm255_vm1, %v254_v60, 0.0 }
 0x77b   :  { %v196_v51 = vadd.f32 %v195_v44, %v181_v41 }
 0x77d   :  { %v197_v30 = vadd.f32 %v196_v51, %v182_v45 }
 0x781   :  { %v1160_v47 = vpop.eup %1159 }
 0x782   :  { %v736_v57 = vmax.f32 %v691_v48, %v1160_v47  ;;  %v198_v47 = vadd.f32 %v197_v30, %v183_v6 }
 0x784   :  { %v742_v43 = vsel %vm741_vm14, %v736_v57, %v691_v48  ;;  %v1270_v48 = vmov 1   ;;  %v161_v57 = vadd.f32 %v160_v37, %v146_v55  ;;  %v199_v1 = vadd.f32 %v198_v47, %v184_v7 }
 0x785   :  { %v743_v8 = vpack.c.bf16 %v742_v43, %v742_v43  ;;  %1144 = vset.pattern.permute.xlu0 %v1270_v48 }
 0x786   :  { %v162_v43 = vadd.f32 %v161_v57, %v147_v56 }
 0x787   :  { %1117 = vmatmul.mubr.bf16.vlgmr.msra.gmra.mrb[20].mxu0 %v743_v8  ;;  %v200_v8 = vadd.f32 %v199_v1, %v185_v9 }
 0x789   :  { %v201_v11 = vadd.f32 %v200_v8, %v186_v10 }
 0x78b   :  { %v202_v12 = vadd.f32 %v201_v11, %v187_v62 }
 0x85a   :  { %v782_v3 = vpop.f32.mrb[20].mxu0 }
 0x85b   :  { %v783_v14 = vadd.f32 %v782_v3, %v747_v25  ;;  %v1118_v26 = vpop.f32.mrb[21].mxu0  ;;  %v238_v25 = vadd.f32 %v1676_v39, %v223_v63 }
 0x85c   :  { %v785_v34 = vpop.f32.mrb[22].mxu0  ;;  %v226_v26 = vmul.f32 %v1665_v58, %v1665_v58 }
 0x85d   :  { %v1686_v61 = vsel %vm790_vm15, %v783_v14, -1e+30  ;;  %v1119_v49 = vpop.f32.mrb[23].mxu0  ;;  %v239_v3 = vadd.f32 %v238_v25, %v224_v13  ;;  %v225_v14 = vmul.f32 %v1663_v54, %v1663_v54 }
 0x85e   :  { %792 = vmax.xlane.f32.xlu1 %v1686_v61 }
 0x85f   :  { %v240_v34 = vadd.f32 %v239_v3, %v225_v14 }
 0x861   :  { %v241_v39 = vadd.f32 %v240_v34, %v226_v26 }
 0x862   :  { %163 = vadd.xlane.f32.xlu1 %v162_v43 }
 0x863   :  { %v242_v20 = vadd.f32 %v241_v39, %v227_v53 }
 0x866   :  { %203 = vadd.xlane.f32.xlu1 %v202_v12 }
 0x8eb   :  { %v793_v4 = vpop.xlane.xlu1 %792 }
 0x8ec   :  { %v794_v17 = vsub.f32 %v1686_v61, %v793_v4 }
 0x8ee   :  { %v795_v59 = vmul.f32 1.442695, %v794_v17 }
 0x8ef   :  { %v164_v21 = vpop.xlane.xlu1 %163 }
 0x8f0   :  { %1161 = vpow2.f32 %v795_v59  ;;  %v228_v59 = vmul.f32 %v1672_v5, %v1672_v5  ;;  %v165_v58 = vrot.slane %v164_v21, 4 }
 0x8f2   :  { %v166_v32 = vadd.f32 %v165_v58, %v164_v21  ;;  %v243_v31 = vadd.f32 %v242_v20, %v228_v59 }
 0x8f3   :  { %v204_v29 = vpop.xlane.xlu1 %203 }
 0x8f4   :  { %v167_v33 = vrot.slane %v166_v32, 2  ;;  %v205_v35 = vrot.slane %v204_v29, 4 }
 0x8fa   :  { %v1162_v27 = vpop.eup %1161 }
 0x8fb   :  { %797 = vadd.xlane.f32.xlu0 %v1162_v27 }
 0x911   :  { %806 = vperm.xlu0 %1144, %v1498_v18  }
 0x988   :  { %v798_v15 = vpop.xlane.xlu0 %797 }
 0x989   :  { %1163 = vlog2.f32 %v798_v15 }
 0x990   :  { %v807_v52 = vpop.permute.xlu0 %806 }
 0x991   :  { %vm809_vm0 = vcmp.eq.f32.partialorder %v803_v16, %v807_v52 }
 0x992   :  { %v851_v17 = vsel %vm809_vm0, 1.0, %v1267_v0  ;;  %v206_v0 = vadd.f32 %v205_v35, %v204_v29 }
 0x993   :  { %v1164_v49 = vpop.eup %1163 }
 0x994   :  { %v800_v18 = vmul.f32 0.6931472, %v1164_v49  ;;  %v207_v38 = vrot.slane %v206_v0, 2 }
 0x996   :  { %v801_v48 = vadd.f32 %v800_v18, %v793_v4  ;;  %v168_v4 = vadd.f32 %v167_v33, %v166_v32  ;;  %v208_v28 = vadd.f32 %v207_v38, %v206_v0 }
 0x998   :  { %v802_v54 = vsub.f32 %v1686_v61, %v801_v48  ;;  %v169_v27 = vrot.slane %v168_v4, 1  ;;  %v209_v36 = vrot.slane %v208_v28, 1 }
 0x99a   :  { %v812_v23 = vmul.f32 %v851_v17, %v802_v54  ;;  %v170_v5 = vadd.f32 %v169_v27, %v168_v4  ;;  %v210_v42 = vadd.f32 %v209_v36, %v208_v28 }
 0x99c   :  { %813 = vadd.xlane.f32.xlu1 %v812_v23  ;;  %1120 = vpush %v170_v5 }
 0x99d   :  { %1122 = vpush %v210_v42 }
 0x9a0   :  { %244 = vadd.xlane.f32.xlu1 %v243_v31 }
 0x9a4   :  { %257 = vadd.xlane.f32.xlu1 %v256_v19 }
 0x9cd   :  { %s1121_s0 = spop %1120 }
 0x9ce   :  { %s1123_s5 = spop %1122 }
 0x9cf   :  { %s212_s29 = sadd.f32 %s1123_s5, %s1121_s0 }
 0xa29   :  { %v814_v40 = vpop.xlane.xlu1 %813 }
 0xa2a   :  { %v815_v41 = vsub.f32 0.0, %v814_v40 }
 0xa2c   :  { %v817_v44 = vsel %vm816_vm2, %v815_v41, 0.0 }
 0xa2d   :  { %818 = vadd.xlane.f32.xlu1 %v817_v44  ;;  %v245_v24 = vpop.xlane.xlu1 %244 }
 0xa2e   :  { %v246_v50 = vrot.slane %v245_v24, 4 }
 0xa30   :  { %v247_v45 = vadd.f32 %v246_v50, %v245_v24 }
 0xa31   :  { %v258_v51 = vpop.xlane.xlu1 %257 }
 0xa32   :  { %v248_v46 = vrot.slane %v247_v45, 2  ;;  %v259_v6 = vrot.slane %v258_v51, 4 }
 0xa34   :  { %v260_v30 = vadd.f32 %v259_v6, %v258_v51  ;;  %v249_v55 = vadd.f32 %v248_v46, %v247_v45 }
 0xa36   :  { %v261_v37 = vrot.slane %v260_v30, 2  ;;  %v250_v7 = vrot.slane %v249_v55, 1 }
 0xa38   :  { %v251_v47 = vadd.f32 %v250_v7, %v249_v55  ;;  %v262_v56 = vadd.f32 %v261_v37, %v260_v30 }
 0xa3a   :  { %1124 = vpush %v251_v47  ;;  %v263_v57 = vrot.slane %v262_v56, 1 }
 0xa3c   :  { %v264_v9 = vadd.f32 %v263_v57, %v262_v56 }
 0xa3e   :  { %1126 = vpush %v264_v9 }
 0xa6b   :  { %s1125_s28 = spop %1124 }
 0xa6c   :  { %s253_s30 = sadd.f32 %s1125_s28, %s212_s29 }
 0xa6f   :  { %s1127_s8 = spop %1126 }
 0xa70   :  { %s266_s9 = sadd.f32 %s1127_s8, %s253_s30 }
 0xa72   :  { %v269_v1 = vstv %s266_s9 }
 0xa73   :  { %1165 = vrsqrt.f32 %v269_v1  ;;  %vm272_vm3 = vcmp.eq.f32.partialorder %v269_v1, inf  ;;  %v275_v8 = vand.u32 2147483648, %v269_v1  ;;  %vm274_vm4 = vcmp.eq.f32.partialorder %v269_v1, 0.0 }
 0xa7d   :  { %v1166_v43 = vpop.eup %1165 }
 0xa7e   :  { %v271_v10 = vmul.f32 %v1166_v43, %v269_v1 }
 0xa80   :  { %v273_v62 = vsel %vm272_vm3, %v269_v1, %v271_v10 }
 0xa81   :  { %v276_v11 = vsel %vm274_vm4, %v275_v8, %v273_v62 }
 0xa82   :  { %1128 = vpush %v276_v11 }
 0xab3   :  { %s1129_s15 = spop %1128 }
 0xab4   :  { %s278_s16 = smul.f32 %s1129_s15, %s268_s12 }
 0xaba   :  { %v819_v12 = vpop.xlane.xlu1 %818 }
 0xabb   :  { %v820_v63 = vrot.slane %v819_v12, 4 }
 0xabd   :  { %v821_v13 = vadd.f32 %v820_v63, %v819_v12 }
 0xabf   :  { %v822_v25 = vrot.slane %v821_v13, 2 }
 0xac1   :  { %v823_v3 = vadd.f32 %v822_v25, %v821_v13 }
 0xac3   :  { %v824_v15 = vrot.slane %v823_v3, 1 }
 0xac5   :  { %v825_v14 = vadd.f32 %v824_v15, %v823_v3 }
 0xac7   :  { %1130 = vpush %v825_v14 }
 0xaf8   :  { %s1131_s1 = spop %1130 }
 0xaf9   :  { %s827_s27 = smul.f32 0.125, %s1131_s1 }
 0xafb   :  { %s828_s17 = sadd.f32 %s827_s27, %s278_s16 }
 0xafd   :  { %v834_v16 = vstv %s828_s17 }
 0xafe   :  { %v835_v26 = vsel %vm833_vm7, %v834_v16, %v1686_v61 }
 0xaff   :  { %836 = vst [vmem:[%s1763_s7] sm:$0xff] %v835_v26 }
 0xb00   :  { %841 = vsyncpa [#allocation4], 1 }
 0xb01   :  { %842 = vsyncpa [#allocation6], 1 }
 0xb02   :  { %843 = vsyncpa [#allocation9], 1 }

</bundles_post_ra>
